<compile_context>
chip_gen: v7x
topology: tpu7x:2x2x1
jax: 0.10.0
libtpu: 0.0.40
codegen_flags: <defaults>
</compile_context>

<pallas_src>
import functools
import math

import jax
import jax.numpy as jnp
from jax.experimental import pallas as pl
from jax.experimental.pallas import tpu as pltpu

_LANES = 128
_TILE_BYTES_TARGET = 4 << 20     # ~4 MiB per output tile
_MAX_TILE_ROWS = 8192            # sublane-tile cap (multiple of 8)


def _round_up8(x: int) -> int:
    return max(8, x + (-x) % 8)


def _pick_tile(total_rows: int, row_elems: int, itemsize: int) -> int:
    """Largest sublane tile (mult. of 8, ~<=4MiB) or the full extent."""
    cap = _TILE_BYTES_TARGET // max(1, row_elems * itemsize)
    cap = max(8, min(_MAX_TILE_ROWS, cap - cap % 8))
    if total_rows <= cap:
        if total_rows >= 1024:
            # Split in two so v7x's two TensorCores can both take a tile.
            return min(cap, _round_up8(-(-total_rows // 2)))
        return total_rows
    return cap


def _vmem_limit(tile_rows: int, row_elems: int, itemsize: int) -> int:
    """2 outputs x 2 pipeline buffers x tile, plus slack; within every gen's VMEM."""
    tile_bytes = tile_rows * row_elems * itemsize
    return int(min(max(4 * tile_bytes + (8 << 20), 16 << 20), 48 << 20))


# --------------------------------------------------------------------------
# Kernels
# --------------------------------------------------------------------------
def _rotary_full_kernel(inv_full_ref, sin_ref, cos_ref, *, tile_n: int):
    """General path: inv_full_ref is (1, dim) (already duplicated); block (tile_n, dim)."""
    blk, dim = sin_ref.shape
    row = jax.lax.broadcasted_iota(jnp.int32, (blk, dim), 0) + pl.program_id(0) * tile_n
    freqs = row.astype(jnp.float32) * inv_full_ref[...]
    sin_ref[...] = jnp.sin(freqs).astype(sin_ref.dtype)
    cos_ref[...] = jnp.cos(freqs).astype(cos_ref.dtype)


def _rotary_halfstore_kernel(inv_half_ref, sin_ref, cos_ref, *, tile_n: int):
    """dim % 256 == 0: compute sin/cos on the half width once, store into both halves."""
    blk, dim = sin_ref.shape
    half = dim // 2
    row = jax.lax.broadcasted_iota(jnp.int32, (blk, half), 0) + pl.program_id(0) * tile_n
    freqs = row.astype(jnp.float32) * inv_half_ref[...]
    s = jnp.sin(freqs).astype(sin_ref.dtype)
    c = jnp.cos(freqs).astype(cos_ref.dtype)
    sin_ref[:, :half] = s
    sin_ref[:, half:] = s
    cos_ref[:, :half] = c
    cos_ref[:, half:] = c


def _rotary_repack_kernel(inv_row_ref, posoff_ref, sin_ref, cos_ref, *,
                          tile_r: int, ppr: int):
    """dim not a multiple of 128: lane-dense (rows, lcm(dim,128)) output,
    ppr = positions per row; posoff/inv rows encode the periodic pattern."""
    blk, w = sin_ref.shape
    row = jax.lax.broadcasted_iota(jnp.int32, (blk, w), 0) + pl.program_id(0) * tile_r
    # Exact-integer f32 math (row*ppr + posoff < 2^24), single rounding at *inv.
    pos = row.astype(jnp.float32) * float(ppr) + posoff_ref[...]
    freqs = pos * inv_row_ref[...]
    sin_ref[...] = jnp.sin(freqs).astype(sin_ref.dtype)
    cos_ref[...] = jnp.cos(freqs).astype(cos_ref.dtype)


# --------------------------------------------------------------------------
# Wrapper
# --------------------------------------------------------------------------
def make_rotary_embedding(dim: int, out_dtype=jnp.float32):
    """Returns (inv_freqs, forward_fn) mirroring RotaryEmbedding(dim).forward(n)."""
    assert dim % 2 == 0, "rotary dim must be even"
    half = dim // 2
    inv_freqs = 1.0 / (10000.0 ** (jnp.arange(0, dim, 2, dtype=jnp.float32) / dim))
    inv_full = jnp.concatenate([inv_freqs, inv_freqs])            # (dim,)
    itemsize = jnp.dtype(out_dtype).itemsize

    def forward(n: int):
        if dim % _LANES == 0:
            # Row is already lane-dense.
            tile_n = _pick_tile(n, dim, itemsize)
            grid = (pl.cdiv(n, tile_n),)
            out_shape = (jax.ShapeDtypeStruct((n, dim), out_dtype),
                         jax.ShapeDtypeStruct((n, dim), out_dtype))
            out_specs = (pl.BlockSpec((tile_n, dim), lambda i: (i, 0)),
                         pl.BlockSpec((tile_n, dim), lambda i: (i, 0)))
            if half % _LANES == 0:
                # Half-width compute, double (128-aligned) store.
                kernel = functools.partial(_rotary_halfstore_kernel, tile_n=tile_n)
                inv_in = inv_freqs.reshape(1, half)
                inv_spec = pl.BlockSpec((1, half), lambda i: (0, 0))
            else:
                kernel = functools.partial(_rotary_full_kernel, tile_n=tile_n)
                inv_in = inv_full.reshape(1, dim)
                inv_spec = pl.BlockSpec((1, dim), lambda i: (0, 0))
            sin2d, cos2d = pl.pallas_call(
                kernel,
                grid=grid,
                out_shape=out_shape,
                in_specs=[inv_spec],
                out_specs=out_specs,
                compiler_params=pltpu.CompilerParams(
                    dimension_semantics=("parallel",),
                    vmem_limit_bytes=_vmem_limit(tile_n, dim, itemsize)),
            )(inv_in)
        else:
            # dim not a multiple of 128: generalized lane-dense repack.
            g = math.gcd(dim, _LANES)
            w = dim * _LANES // g                 # lcm(dim, 128): row width
            ppr = _LANES // g                     # positions per row (power of 2)
            if n % ppr == 0:
                rows = n // ppr
                tile_r = _pick_tile(rows, w, itemsize)
                inv_row = jnp.tile(inv_full, ppr).reshape(1, w)
                posoff = jnp.repeat(jnp.arange(ppr, dtype=jnp.float32), dim).reshape(1, w)
                sin2d, cos2d = pl.pallas_call(
                    functools.partial(_rotary_repack_kernel, tile_r=tile_r, ppr=ppr),
                    grid=(pl.cdiv(rows, tile_r),),
                    out_shape=(jax.ShapeDtypeStruct((rows, w), out_dtype),
                               jax.ShapeDtypeStruct((rows, w), out_dtype)),
                    in_specs=[pl.BlockSpec((1, w), lambda i: (0, 0)),   # resident
                              pl.BlockSpec((1, w), lambda i: (0, 0))],  # resident
                    out_specs=(pl.BlockSpec((tile_r, w), lambda i: (i, 0)),
                               pl.BlockSpec((tile_r, w), lambda i: (i, 0))),
                    compiler_params=pltpu.CompilerParams(
                        dimension_semantics=("parallel",),
                        vmem_limit_bytes=_vmem_limit(tile_r, w, itemsize)),
                )(inv_row, posoff)
                sin2d = sin2d.reshape(n, dim)     # free row-major reshape
                cos2d = cos2d.reshape(n, dim)
            else:
                # Fallback when n doesn't pack into whole lane-dense rows
                # (masked partial stores -- correct, just slower).
                tile_n = _pick_tile(n, dim, itemsize)
                sin2d, cos2d = pl.pallas_call(
                    functools.partial(_rotary_full_kernel, tile_n=tile_n),
                    grid=(pl.cdiv(n, tile_n),),
                    out_shape=(jax.ShapeDtypeStruct((n, dim), out_dtype),
                               jax.ShapeDtypeStruct((n, dim), out_dtype)),
                    in_specs=[pl.BlockSpec((1, dim), lambda i: (0, 0))],
                    out_specs=(pl.BlockSpec((tile_n, dim), lambda i: (i, 0)),
                               pl.BlockSpec((tile_n, dim), lambda i: (i, 0))),
                    compiler_params=pltpu.CompilerParams(
                        dimension_semantics=("parallel",),
                        vmem_limit_bytes=_vmem_limit(tile_n, dim, itemsize)),
                )(inv_full.reshape(1, dim))

        # rearrange 'n d -> () n d'
        return sin2d[None], cos2d[None]

    return inv_freqs, forward


# --------------------------------------------------------------------------
# Reference + self-test
# --------------------------------------------------------------------------
def _reference(inv_freqs, n):
    seq = jnp.arange(n, dtype=jnp.float32)
    freqs = jnp.einsum("i,j->ij", seq, inv_freqs)
    freqs = jnp.concatenate([freqs, freqs], axis=-1)[None]
    return jnp.sin(freqs), jnp.cos(freqs)


if __name__ == "__main__":
    _ = jax.random.PRNGKey(0)   # inv_freqs is deterministic; key kept for convention

    # Small shapes exercising every code path.
    cases = (
        (32, 8, jnp.float32),     # repack, w = 128
        (96, 8, jnp.float32),     # repack, w = 384 (non-128-multiple dim, no masked stores)
        (96, 6, jnp.float32),     # fallback full kernel (masked stores)
        (256, 16, jnp.float32),   # half-width compute, double store
        (128, 16, jnp.float32),   # full kernel, lane-aligned
        (64, 16, jnp.bfloat16),   # bf16 output (halves HBM writeback)
    )
    for dim, n, dt in cases:
        inv_freqs, rotary_fwd = make_rotary_embedding(dim, out_dtype=dt)
        sin, cos = jax.block_until_ready(rotary_fwd(n))

        sin_ref, cos_ref = _reference(inv_freqs, n)
        assert sin.shape == (1, n, dim) and cos.shape == (1, n, dim), (dim, n, sin.shape)
        tol = 1e-2 if dt == jnp.bfloat16 else 1e-5
        assert jnp.allclose(sin.astype(jnp.float32), sin_ref, atol=tol, rtol=tol), \
            ("sin mismatch", dim, n, dt)
        assert jnp.allclose(cos.astype(jnp.float32), cos_ref, atol=tol, rtol=tol), \
            ("cos mismatch", dim, n, dt)

    print("KERNEL_OK")
</pallas_src>

<mosaic_0001>
module attributes {stable_mosaic.version = 11 : i64} {
  func.func @_rotary_repack_kernel(%arg0: i32, %arg1: memref<1x128xf32, #tpu.memory_space<vmem>>, %arg2: memref<1x128xf32, #tpu.memory_space<vmem>>, %arg3: memref<2x128xf32, #tpu.memory_space<vmem>>, %arg4: memref<2x128xf32, #tpu.memory_space<vmem>>) attributes {dimension_semantics = [#tpu.dimension_semantics<parallel>], iteration_bounds = array<i64: 1>, scalar_prefetch = 0 : i64, scratch_operands = 0 : i64, tpu.core_type = #tpu.core_type<tc>, window_params = [{pipeline_mode = #tpu.pipeline_mode<synchronous>, transform_indices = @transform_0, window_bounds = array<i64: 1, 128>}, {pipeline_mode = #tpu.pipeline_mode<synchronous>, transform_indices = @transform_1, window_bounds = array<i64: 1, 128>}, {transform_indices = @transform_2, window_bounds = array<i64: 2, 128>}, {transform_indices = @transform_3, window_bounds = array<i64: 2, 128>}]} {
    %0 = tpu.iota {dimensions = array<i32: 0>} : vector<2x128xi32>
    %c2_i32 = arith.constant 2 : i32
    %1 = arith.muli %arg0, %c2_i32 : i32
    %2 = vector.broadcast %1 : i32 to vector<2x128xi32>
    %3 = arith.addi %0, %2 : vector<2x128xi32>
    %4 = arith.sitofp %3 : vector<2x128xi32> to vector<2x128xf32>
    %cst = arith.constant 4.000000e+00 : f32
    %5 = vector.broadcast %cst : f32 to vector<2x128xf32>
    %6 = arith.mulf %4, %5 : vector<2x128xf32>
    %c0 = arith.constant 0 : index
    %c0_0 = arith.constant 0 : index
    %7 = vector.load %arg2[%c0, %c0_0] : memref<1x128xf32, #tpu.memory_space<vmem>>, vector<1x128xf32>
    %8 = vector.broadcast %7 : vector<1x128xf32> to vector<2x128xf32>
    %9 = arith.addf %6, %8 : vector<2x128xf32>
    %c0_1 = arith.constant 0 : index
    %c0_2 = arith.constant 0 : index
    %10 = vector.load %arg1[%c0_1, %c0_2] : memref<1x128xf32, #tpu.memory_space<vmem>>, vector<1x128xf32>
    %11 = vector.broadcast %10 : vector<1x128xf32> to vector<2x128xf32>
    %12 = arith.mulf %9, %11 : vector<2x128xf32>
    %13 = math.sin %12 : vector<2x128xf32>
    %c0_3 = arith.constant 0 : index
    %c0_4 = arith.constant 0 : index
    %14 = vector.load %arg3[%c0_3, %c0_4] : memref<2x128xf32, #tpu.memory_space<vmem>>, vector<2x128xf32>
    tpu.vector_store %arg3[%c0_3, %c0_4], %13 {strides = array<i32>} : memref<2x128xf32, #tpu.memory_space<vmem>>, vector<2x128xf32>,
    %15 = math.cos %12 : vector<2x128xf32>
    %c0_5 = arith.constant 0 : index
    %c0_6 = arith.constant 0 : index
    %16 = vector.load %arg4[%c0_5, %c0_6] : memref<2x128xf32, #tpu.memory_space<vmem>>, vector<2x128xf32>
    tpu.vector_store %arg4[%c0_5, %c0_6], %15 {strides = array<i32>} : memref<2x128xf32, #tpu.memory_space<vmem>>, vector<2x128xf32>,
    return
  }
  func.func @transform_0(%arg0: i32) -> (i32, i32) {
    %c0_i32 = arith.constant 0 : i32
    %c0_i32_0 = arith.constant 0 : i32
    %c0_i32_1 = arith.constant 0 : i32
    return %c0_i32, %c0_i32_0 : i32, i32
  }
  func.func @transform_1(%arg0: i32) -> (i32, i32) {
    %c0_i32 = arith.constant 0 : i32
    %c0_i32_0 = arith.constant 0 : i32
    %c0_i32_1 = arith.constant 0 : i32
    return %c0_i32, %c0_i32_0 : i32, i32
  }
  func.func @transform_2(%arg0: i32) -> (i32, i32) {
    %c0_i32 = arith.constant 0 : i32
    %c0_i32_0 = arith.constant 0 : i32
    return %arg0, %c0_i32 : i32, i32
  }
  func.func @transform_3(%arg0: i32) -> (i32, i32) {
    %c0_i32 = arith.constant 0 : i32
    %c0_i32_0 = arith.constant 0 : i32
    return %arg0, %c0_i32 : i32, i32
  }
}

</mosaic_0001>

<bundles_post_ra>
// kernel: tpu_custom_call.1
= control target key start
LH: loop header
LB: loop body
LE: loop exit
PB: predicated region body
PF: predicated region fallthrough
CT: control target
= control target key end

     0   :  { %9 = vsyncpa [#allocation3], 0  ;;  %s476_s0 = inlined_call_operand.hbm [shape: f32[1,128], index: 0, kind: input, shape index: {}]   ;;  %s477_s1 = inlined_call_operand.vmem [shape: f32[1,128], index: 1, kind: input, shape index: {}]   ;;  %s478_s2 = inlined_call_operand.hbm [shape: f32[2,128], index: 2, kind: output, shape index: {0}]   ;;  %s479_s3 = inlined_call_operand.hbm [shape: f32[2,128], index: 3, kind: output, shape index: {1}]  }
   0x1   :  { %10 = vsyncpa [#allocation4], 0 }
   0x2   :  { %11 = vsyncpa [#allocation7], 0  ;;  %s387_s12 = smov [#allocation2]   ;;  %s315_s16 = scalar_lea.hbm %s476_s0, 16 }
   0x3   :  { %s18_s13 = sshll.u32 %s387_s12, 4  ;;  %p316_p0 = scmp.ne.s32.totalorder %s476_s0, %s315_s16  ;;  %s19_s13 = int_to_ptr.vmem [resolvable:$true] %s18_s13 }
   0x4   :  { %p319_p1 = scmp.lt.u32.totalorder %s315_s16, %s476_s0 }
   0x6   :  { %p321_p2 = pnand %p319_p1, %p316_p0 }
   0x8   :  { %324 = shalt.err (!%p321_p2)
}
   0x9   :  { %s325_s21 = scalar_lea.vmem %s19_s13, 16  ;;  %s329_s22 = scalar_lea.vmem %s19_s13, 32 }
   0xa   :  { %p326_p3 = scmp.ne.s32.totalorder %s19_s13, %s325_s21  ;;  %p330_p4 = scmp.lt.s32.totalorder %s19_s13, %s19_s13 }
   0xb   :  { %p331_p5 = scmp.lt.s32.totalorder %s329_s22, %s325_s21 }
   0xd   :  { %p332_p6 = por %p331_p5, %p330_p4 }
   0xf   :  { %p333_p7 = pnand %p332_p6, %p326_p3 }
  0x11   :  { %336 = shalt.err (!%p333_p7)
}
  0x12   :  { %21 = dma.hbm_to_vmem [thread:$0]  %s476_s0, 16, %s19_s13, [#allocation3]  }
  0x13   :  { %381 = dma.done.wait [#allocation3], 16  }
  0x14   :  { %382 = vsyncadd [#allocation3], 4294967280  ;;  %v27_v0 = vlaneseq  ;;  %v288_v4 = vld [vmem:[%s477_s1] ss:$0 sm:$0xff]  ;;  %v388_v19 = vmov 683565275  }
  0x15   :  { %v289_v5 = vld [vmem:[#allocation2] ss:$0 sm:$0xff]  ;;  %v389_v21 = vmov 2475754826   ;;  %v390_v23 = vmov 2131351028  }
  0x16   :  { %v28_v1 = vshrl.u32 %v27_v0, 7  ;;  %v391_v25 = vmov 2102212464   ;;  %v392_v27 = vmov 920167782   ;;  %s394_s0 = smov [#allocation5]  }
  0x17   :  { %v393_v34 = vmov 1326507024   ;;  %s265_s1 = sshll.u32 %s394_s0, 4  ;;  %s395_s27 = smov [#allocation6]   ;;  %s266_s1 = int_to_ptr.vmem [resolvable:$true] %s265_s1 }
  0x18   :  { %v32_v2 = vcvt.s32.f32 %v28_v1  ;;  %s275_s28 = sshll.u32 %s395_s27, 4  ;;  %s337_s29 = scalar_lea.vmem %s266_s1, 32  ;;  %s276_s28 = int_to_ptr.vmem [resolvable:$true] %s275_s28 }
  0x19   :  { %p338_p8 = scmp.ne.s32.totalorder %s266_s1, %s337_s29  ;;  %p342_p9 = scmp.lt.s32.totalorder %s266_s1, %s266_s1 }
  0x1a   :  { %v33_v3 = vmul.f32 4.0, %v32_v2  ;;  %p343_p10 = scmp.lt.s32.totalorder %s337_s29, %s337_s29 }
  0x1c   :  { %v41_v6 = vadd.f32 %v288_v4, %v33_v3  ;;  %p344_p11 = por %p343_p10, %p342_p9 }
  0x1e   :  { %v431_v7 = vmul.f32 %v289_v5, %v41_v6  ;;  %p345_p12 = pnand %p344_p11, %p338_p8 }
  0x20   :  { %v53_v8 = vand.u32 2139095040, %v431_v7  ;;  %v50_v10 = vand.u32 2147483647, %v431_v7  ;;  %vm52_vm7 = vcmp.lt.s32.totalorder %v431_v7, 0  ;;  %vm142_vm15 = vweird.f32 %v431_v7 }
  0x22   :  { %v54_v9 = vshrl.u32 %v53_v8, 23  ;;  %v57_v13 = vand.u32 8388607, %v50_v10  ;;  %vm51_vm8 = vcmp.le.f32.partialorder %v50_v10, 0.7853982 }
  0x24   :  { %v290_v11 = vadd.s32 4294967169, %v54_v9  ;;  %v58_v16 = vor.u32 8388608, %v57_v13 }
  0x26   :  { %v60_v12 = vadd.s32 1, %v290_v11  ;;  %v98_v36 = vshll.u32 %v58_v16, 8 }
  0x28   :  { %vm61_vm0 = vcmp.gt.s32.totalorder %v60_v12, 0 }
  0x29   :  { %v62_v14 = vsel %vm61_vm0, %v60_v12, 0 }
  0x2a   :  { %v64_v15 = vand.u32 31, %v62_v14  ;;  %v63_v17 = vshrl.u32 %v62_v14, 5 }
  0x2c   :  { %v65_v18 = vsub.s32 32, %v64_v15  ;;  %v67_v20 = vshll.u32 %v388_v19, %v64_v15  ;;  %v70_v22 = vshll.u32 %v389_v21, %v64_v15  ;;  %v73_v24 = vshll.u32 %v390_v23, %v64_v15 }
  0x2d   :  { %v76_v26 = vshll.u32 %v391_v25, %v64_v15  ;;  %v79_v28 = vshll.u32 %v392_v27, %v64_v15  ;;  %vm82_vm1 = vcmp.lt.s32.totalorder %v63_v17, 1  ;;  %vm85_vm2 = vcmp.lt.s32.totalorder %v63_v17, 4 }
  0x2e   :  { %v66_v29 = vshrl.u32 %v388_v19, %v65_v18  ;;  %v68_v30 = vshrl.u32 %v389_v21, %v65_v18  ;;  %v71_v31 = vshrl.u32 %v390_v23, %v65_v18  ;;  %v74_v32 = vshrl.u32 %v391_v25, %v65_v18 }
  0x2f   :  { %v77_v33 = vshrl.u32 %v392_v27, %v65_v18  ;;  %v80_v35 = vshrl.u32 %v393_v34, %v65_v18  ;;  %vm83_vm3 = vcmp.lt.s32.totalorder %v63_v17, 2  ;;  %vm84_vm4 = vcmp.lt.s32.totalorder %v63_v17, 3 }
  0x30   :  { %v69_v37 = vor.u32 %v68_v30, %v67_v20  ;;  %v72_v38 = vor.u32 %v71_v31, %v70_v22  ;;  %v75_v39 = vor.u32 %v74_v32, %v73_v24 }
  0x31   :  { %v78_v40 = vor.u32 %v77_v33, %v76_v26  ;;  %v81_v41 = vor.u32 %v80_v35, %v79_v28 }
  0x32   :  { %v86_v42 = vsel %vm82_vm1, %v66_v29, %v69_v37  ;;  %v87_v43 = vsel %vm85_vm2, %v75_v39, 2102212464  ;;  %v90_v44 = vsel %vm82_vm1, %v69_v37, %v72_v38  ;;  %v94_v45 = vsel %vm82_vm1, %v72_v38, %v75_v39 }
  0x33   :  { %v88_v46 = vsel %vm84_vm4, %v72_v38, %v87_v43  ;;  %v91_v47 = vsel %vm85_vm2, %v78_v40, 920167782  ;;  %v95_v48 = vsel %vm85_vm2, %v81_v41, 1326507024 }
  0x34   :  { %v92_v49 = vsel %vm84_vm4, %v75_v39, %v91_v47  ;;  %v96_v50 = vsel %vm84_vm4, %v78_v40, %v95_v48  ;;  %v89_v51 = vsel %vm83_vm3, %v86_v42, %v88_v46 }
  0x35   :  { %v93_v52 = vsel %vm83_vm3, %v90_v44, %v92_v49  ;;  %v97_v53 = vsel %vm83_vm3, %v94_v45, %v96_v50  ;;  %v105_v58 = vmul.u32 %v98_v36, %v89_v51 }
  0x36   :  { %v437_v54 = vmul.u32.u64.low %v98_v36, %v97_v53  ;;  %v438_v55 = vmul.u32.u64.high %v98_v36, %v97_v53, %v437_v54  ;;  %v440_v56 = vmul.u32.u64.low %v98_v36, %v93_v52  ;;  %v441_v57 = vmul.u32.u64.high %v98_v36, %v93_v52, %v440_v56 }
  0x38   :  { %vm107_vm5 = vc.u32 %v438_v55, %v440_v56  ;;  %v108_v59 = vadd.s32 1, %v441_v57  ;;  %v106_v6 = vadd.s32 %v440_v56, %v438_v55 }
  0x3a   :  { %v109_v60 = vsel %vm107_vm5, %v108_v59, %v441_v57 }
  0x3b   :  { %v110_v61 = vadd.s32 %v109_v60, %v105_v58 }
  0x3d   :  { %v111_v62 = vadd.s32 536870912, %v110_v61 }
  0x3f   :  { %v112_v63 = vshrl.u32 %v111_v62, 30 }
  0x41   :  { %v113_v0 = vshll.u32 %v112_v63, 30  ;;  %v136_v20 = vsub.s32 4, %v112_v63 }
  0x43   :  { %v114_v1 = vsub.s32 %v110_v61, %v113_v0  ;;  %v137_v23 = vsel %vm52_vm7, %v136_v20, %v112_v63 }
  0x44   :  { %v139_v26 = vsel %vm51_vm8, 0, %v137_v23 }
  0x45   :  { %v116_v2 = vsub.s32 0, %v114_v1  ;;  %v143_v27 = vadd.s32 3, %v139_v26  ;;  %v248_v29 = vand.u32 3, %v139_v26 }
  0x47   :  { %v291_v3 = vmin.u32 %v116_v2, %v114_v1  ;;  %v144_v28 = vand.u32 3, %v143_v27  ;;  %vm253_vm10 = vcmp.eq.s32.totalorder %v248_v29, 2  ;;  %vm250_vm12 = vcmp.eq.s32.totalorder %v248_v29, 0 }
  0x48   :  { %vm249_vm14 = vcmp.lt.s32.totalorder %v248_v29, 2 }
  0x49   :  { %v118_v4 = vclz %v291_v3  ;;  %vm149_vm9 = vcmp.eq.s32.totalorder %v144_v28, 2  ;;  %vm146_vm11 = vcmp.eq.s32.totalorder %v144_v28, 0  ;;  %vm145_vm13 = vcmp.lt.s32.totalorder %v144_v28, 2 }
  0x4b   :  { %v292_v5 = vadd.s32 4294967294, %v118_v4 }
  0x4d   :  { %vm293_vm6 = vcmp.lt.s32.totalorder %v292_v5, 0 }
  0x4e   :  { %v121_v8 = vsel %vm293_vm6, 0, %v292_v5 }
  0x4f   :  { %v122_v9 = vsub.s32 32, %v121_v8  ;;  %v123_v11 = vshll.u32 %v114_v1, %v121_v8  ;;  %v126_v12 = vsub.s32 4294967266, %v121_v8 }
  0x51   :  { %v124_v13 = vshrl.u32 %v106_v6, %v122_v9  ;;  %v127_v14 = vadd.s32 127, %v126_v12 }
  0x53   :  { %v125_v15 = vor.u32 %v124_v13, %v123_v11  ;;  %v128_v16 = vshll.u32 %v127_v14, 23 }
  0x55   :  { %v129_v17 = vor.u32 4788187, %v128_v16  ;;  %v132_v18 = vcvt.s32.f32 %v125_v15 }
  0x57   :  { %v130_v19 = vand.u32 2147483647, %v129_v17 }
  0x59   :  { %v133_v21 = vmul.f32 %v132_v18, %v130_v19 }
  0x5b   :  { %v134_v22 = vxor.u32 2147483648, %v133_v21 }
  0x5d   :  { %v135_v24 = vsel %vm52_vm7, %v134_v22, %v133_v21 }
  0x5e   :  { %v138_v25 = vsel %vm51_vm8, %v431_v7, %v135_v24 }
  0x5f   :  { %311 = vcosq.f32 %v138_v25 }
  0x60   :  { %313 = vsinq.f32 %v138_v25 }
  0x69   :  { %v312_v30 = vpop.eup %311 }
  0x6a   :  { %v314_v31 = vpop.eup %313  ;;  %v150_v32 = vxor.u32 2147483648, %v312_v30 }
  0x6b   :  { %v147_v10 = vxor.u32 2147483648, %v314_v31 }
  0x6c   :  { %v151_v33 = vsel %vm149_vm9, %v150_v32, %v314_v31  ;;  %v255_v34 = vsel %vm253_vm10, %v150_v32, %v314_v31 }
  0x6d   :  { %v148_v35 = vsel %vm146_vm11, %v312_v30, %v147_v10  ;;  %v252_v36 = vsel %vm250_vm12, %v312_v30, %v147_v10 }
  0x6e   :  { %v152_v37 = vsel %vm145_vm13, %v148_v35, %v151_v33  ;;  %v256_v38 = vsel %vm249_vm14, %v252_v36, %v255_v34 }
  0x6f   :  { %v153_v39 = vsel %vm142_vm15, nan, %v152_v37  ;;  %v257_v40 = vsel %vm142_vm15, nan, %v256_v38 }
  0x70   :  { %154 = vst [vmem:[#allocation5] sm:$0x3] %v153_v39  ;;  %258 = vst [vmem:[#allocation6] sm:$0x3] %v257_v40 }
  0x71   :  { %348 = shalt.err (!%p345_p12)
}
  0x72   :  { %s349_s5 = scalar_lea.hbm %s478_s2, 32 }
  0x73   :  { %p350_p13 = scmp.ne.s32.totalorder %s478_s2, %s349_s5  ;;  %p353_p0 = scmp.lt.u32.totalorder %s349_s5, %s478_s2 }
  0x75   :  { %p355_p1 = pnand %p353_p0, %p350_p13 }
  0x77   :  { %358 = shalt.err (!%p355_p1)
}
  0x78   :  { %268 = dma.vmem_to_hbm [thread:$0]  %s266_s1, 32, %s478_s2, [#allocation4]  }
  0x79   :  { %s359_s12 = scalar_lea.vmem %s276_s28, 32  ;;  %p364_p3 = scmp.lt.s32.totalorder %s276_s28, %s276_s28 }
  0x7a   :  { %p360_p2 = scmp.ne.s32.totalorder %s276_s28, %s359_s12  ;;  %p365_p4 = scmp.lt.s32.totalorder %s359_s12, %s359_s12 }
  0x7c   :  { %p366_p5 = por %p365_p4, %p364_p3 }
  0x7e   :  { %p367_p6 = pnand %p366_p5, %p360_p2 }
  0x80   :  { %370 = shalt.err (!%p367_p6)
}
  0x81   :  { %s371_s15 = scalar_lea.hbm %s479_s3, 32 }
  0x82   :  { %p372_p7 = scmp.ne.s32.totalorder %s479_s3, %s371_s15  ;;  %p375_p8 = scmp.lt.u32.totalorder %s371_s15, %s479_s3 }
  0x84   :  { %p377_p9 = pnand %p375_p8, %p372_p7 }
  0x86   :  { %380 = shalt.err (!%p377_p9)
}
  0x87   :  { %278 = dma.vmem_to_hbm [thread:$0]  %s276_s28, 32, %s479_s3, [#allocation7]  }
  0x88   :  { %383 = dma.done.wait [#allocation4], 32  }
  0x89   :  { %384 = vsyncadd [#allocation4], 4294967264 }
  0x8a   :  { %385 = dma.done.wait [#allocation7], 32  }
  0x8b   :  { %386 = vsyncadd [#allocation7], 4294967264 }
  0x8c   :  { %285 = vsyncpa [#allocation3], 1 }
  0x8d   :  { %286 = vsyncpa [#allocation4], 1 }
  0x8e   :  { %287 = vsyncpa [#allocation7], 1 }

</bundles_post_ra>
